<compile_context>
chip_gen: v6e
topology: v6e:2x2x1
jax: 0.10.0
libtpu: 0.0.40
codegen_flags: <defaults>
</compile_context>

<pallas_src>
import functools

import jax
import jax.numpy as jnp
from jax.experimental import pallas as pl
from jax.experimental.pallas import tpu as pltpu


def _round_up(x: int, m: int) -> int:
    return (x + m - 1) // m * m


def mlp_kernel(x_ref, w1_ref, b1_ref, w2_ref, b2_ref, w3_ref, b3_ref, o_ref):
    x = x_ref[...]                      # (TM, IN_PAD)  f32
    w1 = w1_ref[...]                    # (IN_PAD, H)   f32
    in_pad = x.shape[1]

    # ---- dense1: K is tiny (state_dim padded to 8) -> rank-1 VPU updates, not MXU ----
    h1 = b1_ref[...]                    # (1, H), broadcasts to (TM, H) on first add
    for k in range(in_pad):             # static unrolled loop (in_pad == 8)
        h1 = h1 + x[:, k:k + 1] * w1[k:k + 1, :]
    h1 = jnp.maximum(h1, 0.0)           # ReLU in f32

    # ---- dense2: bf16 MXU matmul, f32 accumulate, f32 bias + ReLU ----
    h2 = jnp.dot(h1.astype(jnp.bfloat16), w2_ref[...],
                 preferred_element_type=jnp.float32) + b2_ref[...]
    h2 = jnp.maximum(h2, 0.0)

    # ---- dense3: bf16 MXU matmul, f32 accumulate, f32 bias ----
    q = jnp.dot(h2.astype(jnp.bfloat16), w3_ref[...],
                preferred_element_type=jnp.float32) + b3_ref[...]
    o_ref[...] = q.astype(o_ref.dtype)  # lane-dense (TM, 128) store


@functools.partial(jax.jit, static_argnames=("tile_m",))
def mlp_forward(x, w1, b1, w2, b2, w3, b3, *, tile_m=512):
    """x: [B, state_dim] f32; weights stored [in, out]; biases [1, out].
    Returns [B, n_actions] f32."""
    B, state_dim = x.shape
    hidden = w1.shape[1]                # 64
    n_actions = w3.shape[1]

    IN_PAD = _round_up(max(state_dim, 1), 8)       # sublane-aligned tiny K
    H = _round_up(hidden, 128)                     # 64 -> 128 lane-dense hidden
    OUT_PAD = _round_up(max(n_actions, 1), 128)    # 6 -> 128 lane-dense output

    TM = min(tile_m, _round_up(B, 8))              # batch tile (multiple of 8)
    B_pad = _round_up(B, TM)

    f32, bf16 = jnp.float32, jnp.bfloat16
    # Zero padding is mathematically inert under matmul + ReLU.
    xp = jnp.zeros((B_pad, IN_PAD), f32).at[:B, :state_dim].set(x.astype(f32))
    w1p = jnp.zeros((IN_PAD, H), f32).at[:state_dim, :hidden].set(w1)
    b1p = jnp.zeros((1, H), f32).at[:, :hidden].set(b1)
    w2p = jnp.zeros((H, H), bf16).at[:hidden, :hidden].set(w2.astype(bf16))
    b2p = jnp.zeros((1, H), f32).at[:, :hidden].set(b2)
    w3p = jnp.zeros((H, OUT_PAD), bf16).at[:hidden, :n_actions].set(w3.astype(bf16))
    b3p = jnp.zeros((1, OUT_PAD), f32).at[:, :n_actions].set(b3)

    flops = 2 * B_pad * (IN_PAD * H + H * H + H * OUT_PAD)
    bytes_accessed = (
        xp.size * 4 + B_pad * OUT_PAD * 4 +            # x in, q out
        w1p.size * 4 + b1p.size * 4 +
        w2p.size * 2 + b2p.size * 4 +
        w3p.size * 2 + b3p.size * 4
    )

    out = pl.pallas_call(
        mlp_kernel,
        out_shape=jax.ShapeDtypeStruct((B_pad, OUT_PAD), f32),
        grid_spec=pltpu.PrefetchScalarGridSpec(
            num_scalar_prefetch=0,
            grid=(B_pad // TM,),
            in_specs=[
                pl.BlockSpec((TM, IN_PAD), lambda i: (i, 0)),      # x: pipelined over batch
                pl.BlockSpec((IN_PAD, H), lambda i: (0, 0)),       # w1: VMEM-resident
                pl.BlockSpec((1, H), lambda i: (0, 0)),            # b1
                pl.BlockSpec((H, H), lambda i: (0, 0)),            # w2
                pl.BlockSpec((1, H), lambda i: (0, 0)),            # b2
                pl.BlockSpec((H, OUT_PAD), lambda i: (0, 0)),      # w3
                pl.BlockSpec((1, OUT_PAD), lambda i: (0, 0)),      # b3
            ],
            out_specs=pl.BlockSpec((TM, OUT_PAD), lambda i: (i, 0)),
        ),
        compiler_params=pltpu.CompilerParams(
            dimension_semantics=("parallel",),        # shard batch tiles across TCs (v7x)
            vmem_limit_bytes=32 * 1024 * 1024,        # safe on v7x's smaller VMEM
        ),
        cost_estimate=pl.CostEstimate(
            flops=flops, transcendentals=0, bytes_accessed=bytes_accessed),
    )(xp, w1p, b1p, w2p, b2p, w3p, b3p)

    return out[:B, :n_actions]


def init_params(key, state_dim, n_actions, hidden=64):
    """Deterministic init mimicking nn.Linear default U(-1/sqrt(fan_in), 1/sqrt(fan_in))."""
    def linear(key, fan_in, fan_out):
        kw, kb = jax.random.split(key)
        bound = 1.0 / jnp.sqrt(jnp.float32(fan_in))
        # stored as [in, out] so the kernel computes x @ W (== PyTorch x @ W_torch.T)
        w = jax.random.uniform(kw, (fan_in, fan_out), jnp.float32, -bound, bound)
        b = jax.random.uniform(kb, (1, fan_out), jnp.float32, -bound, bound)
        return w, b

    k1, k2, k3 = jax.random.split(key, 3)
    w1, b1 = linear(k1, state_dim, hidden)
    w2, b2 = linear(k2, hidden, hidden)
    w3, b3 = linear(k3, hidden, n_actions)
    return w1, b1, w2, b2, w3, b3


if __name__ == "__main__":
    state_dim = 4      # state_shape = (4,)
    n_actions = 6
    batch = 2

    key = jax.random.PRNGKey(0)
    kx, kp = jax.random.split(key)
    x = jax.random.normal(kx, (batch, state_dim), dtype=jnp.float32)
    params = init_params(kp, state_dim, n_actions)

    qvalues = mlp_forward(x, *params)
    qvalues = jax.block_until_ready(qvalues)

    # Reference in plain JAX matching the kernel's precision policy
    # (f32 dense1, bf16-weight / f32-accumulate dense2 & dense3).
    w1, b1, w2, b2, w3, b3 = params
    bf16, f32 = jnp.bfloat16, jnp.float32
    h1 = jnp.maximum(x @ w1 + b1, 0.0)
    h2 = jnp.maximum(
        jnp.dot(h1.astype(bf16), w2.astype(bf16), preferred_element_type=f32) + b2, 0.0)
    ref = jnp.dot(h2.astype(bf16), w3.astype(bf16), preferred_element_type=f32) + b3

    assert qvalues.shape == (batch, n_actions)
    assert jnp.allclose(qvalues, ref, atol=2e-2, rtol=2e-2), (
        jnp.max(jnp.abs(qvalues - ref)))

    # TODO(synk): autograd `requires_grad` assert and numpy get_qvalues() are host-side
    # PyTorch concerns with no Pallas equivalent; only the forward math is implemented.
    print("KERNEL_OK")
</pallas_src>

<mosaic_0001>
module attributes {stable_mosaic.version = 11 : i64} {
  func.func @mlp_kernel(%arg0: i32, %arg1: memref<8x8xf32, #tpu.memory_space<vmem>>, %arg2: memref<8x128xf32, #tpu.memory_space<vmem>>, %arg3: memref<1x128xf32, #tpu.memory_space<vmem>>, %arg4: memref<128x128xbf16, #tpu.memory_space<vmem>>, %arg5: memref<1x128xf32, #tpu.memory_space<vmem>>, %arg6: memref<128x128xbf16, #tpu.memory_space<vmem>>, %arg7: memref<1x128xf32, #tpu.memory_space<vmem>>, %arg8: memref<8x128xf32, #tpu.memory_space<vmem>>) attributes {dimension_semantics = [#tpu.dimension_semantics<parallel>], iteration_bounds = array<i64: 1>, scalar_prefetch = 0 : i64, scratch_operands = 0 : i64, tpu.core_type = #tpu.core_type<tc>, window_params = [{transform_indices = @transform_0, window_bounds = array<i64: 8, 8>}, {pipeline_mode = #tpu.pipeline_mode<synchronous>, transform_indices = @transform_1, window_bounds = array<i64: 8, 128>}, {pipeline_mode = #tpu.pipeline_mode<synchronous>, transform_indices = @transform_2, window_bounds = array<i64: 1, 128>}, {pipeline_mode = #tpu.pipeline_mode<synchronous>, transform_indices = @transform_3, window_bounds = array<i64: 128, 128>}, {pipeline_mode = #tpu.pipeline_mode<synchronous>, transform_indices = @transform_4, window_bounds = array<i64: 1, 128>}, {pipeline_mode = #tpu.pipeline_mode<synchronous>, transform_indices = @transform_5, window_bounds = array<i64: 128, 128>}, {pipeline_mode = #tpu.pipeline_mode<synchronous>, transform_indices = @transform_6, window_bounds = array<i64: 1, 128>}, {transform_indices = @transform_7, window_bounds = array<i64: 8, 128>}]} {
    %c0 = arith.constant 0 : index
    %c0_0 = arith.constant 0 : index
    %0 = vector.load %arg1[%c0, %c0_0] : memref<8x8xf32, #tpu.memory_space<vmem>>, vector<8x8xf32>
    %c0_1 = arith.constant 0 : index
    %c0_2 = arith.constant 0 : index
    %1 = vector.load %arg2[%c0_1, %c0_2] : memref<8x128xf32, #tpu.memory_space<vmem>>, vector<8x128xf32>
    %c0_3 = arith.constant 0 : index
    %c0_4 = arith.constant 0 : index
    %2 = vector.load %arg3[%c0_3, %c0_4] : memref<1x128xf32, #tpu.memory_space<vmem>>, vector<1x128xf32>
    %3 = vector.extract_strided_slice %0 {offsets = [0, 0], sizes = [8, 1], strides = [1, 1]} : vector<8x8xf32> to vector<8x1xf32>
    %4 = vector.extract_strided_slice %1 {offsets = [0, 0], sizes = [1, 128], strides = [1, 1]} : vector<8x128xf32> to vector<1x128xf32>
    %5 = vector.broadcast %3 : vector<8x1xf32> to vector<8x128xf32>
    %6 = vector.broadcast %4 : vector<1x128xf32> to vector<8x128xf32>
    %7 = arith.mulf %5, %6 : vector<8x128xf32>
    %8 = vector.broadcast %2 : vector<1x128xf32> to vector<8x128xf32>
    %9 = arith.addf %8, %7 : vector<8x128xf32>
    %10 = vector.extract_strided_slice %0 {offsets = [0, 1], sizes = [8, 1], strides = [1, 1]} : vector<8x8xf32> to vector<8x1xf32>
    %11 = vector.extract_strided_slice %1 {offsets = [1, 0], sizes = [1, 128], strides = [1, 1]} : vector<8x128xf32> to vector<1x128xf32>
    %12 = vector.broadcast %10 : vector<8x1xf32> to vector<8x128xf32>
    %13 = vector.broadcast %11 : vector<1x128xf32> to vector<8x128xf32>
    %14 = arith.mulf %12, %13 : vector<8x128xf32>
    %15 = arith.addf %9, %14 : vector<8x128xf32>
    %16 = vector.extract_strided_slice %0 {offsets = [0, 2], sizes = [8, 1], strides = [1, 1]} : vector<8x8xf32> to vector<8x1xf32>
    %17 = vector.extract_strided_slice %1 {offsets = [2, 0], sizes = [1, 128], strides = [1, 1]} : vector<8x128xf32> to vector<1x128xf32>
    %18 = vector.broadcast %16 : vector<8x1xf32> to vector<8x128xf32>
    %19 = vector.broadcast %17 : vector<1x128xf32> to vector<8x128xf32>
    %20 = arith.mulf %18, %19 : vector<8x128xf32>
    %21 = arith.addf %15, %20 : vector<8x128xf32>
    %22 = vector.extract_strided_slice %0 {offsets = [0, 3], sizes = [8, 1], strides = [1, 1]} : vector<8x8xf32> to vector<8x1xf32>
    %23 = vector.extract_strided_slice %1 {offsets = [3, 0], sizes = [1, 128], strides = [1, 1]} : vector<8x128xf32> to vector<1x128xf32>
    %24 = vector.broadcast %22 : vector<8x1xf32> to vector<8x128xf32>
    %25 = vector.broadcast %23 : vector<1x128xf32> to vector<8x128xf32>
    %26 = arith.mulf %24, %25 : vector<8x128xf32>
    %27 = arith.addf %21, %26 : vector<8x128xf32>
    %28 = vector.extract_strided_slice %0 {offsets = [0, 4], sizes = [8, 1], strides = [1, 1]} : vector<8x8xf32> to vector<8x1xf32>
    %29 = vector.extract_strided_slice %1 {offsets = [4, 0], sizes = [1, 128], strides = [1, 1]} : vector<8x128xf32> to vector<1x128xf32>
    %30 = vector.broadcast %28 : vector<8x1xf32> to vector<8x128xf32>
    %31 = vector.broadcast %29 : vector<1x128xf32> to vector<8x128xf32>
    %32 = arith.mulf %30, %31 : vector<8x128xf32>
    %33 = arith.addf %27, %32 : vector<8x128xf32>
    %34 = vector.extract_strided_slice %0 {offsets = [0, 5], sizes = [8, 1], strides = [1, 1]} : vector<8x8xf32> to vector<8x1xf32>
    %35 = vector.extract_strided_slice %1 {offsets = [5, 0], sizes = [1, 128], strides = [1, 1]} : vector<8x128xf32> to vector<1x128xf32>
    %36 = vector.broadcast %34 : vector<8x1xf32> to vector<8x128xf32>
    %37 = vector.broadcast %35 : vector<1x128xf32> to vector<8x128xf32>
    %38 = arith.mulf %36, %37 : vector<8x128xf32>
    %39 = arith.addf %33, %38 : vector<8x128xf32>
    %40 = vector.extract_strided_slice %0 {offsets = [0, 6], sizes = [8, 1], strides = [1, 1]} : vector<8x8xf32> to vector<8x1xf32>
    %41 = vector.extract_strided_slice %1 {offsets = [6, 0], sizes = [1, 128], strides = [1, 1]} : vector<8x128xf32> to vector<1x128xf32>
    %42 = vector.broadcast %40 : vector<8x1xf32> to vector<8x128xf32>
    %43 = vector.broadcast %41 : vector<1x128xf32> to vector<8x128xf32>
    %44 = arith.mulf %42, %43 : vector<8x128xf32>
    %45 = arith.addf %39, %44 : vector<8x128xf32>
    %46 = vector.extract_strided_slice %0 {offsets = [0, 7], sizes = [8, 1], strides = [1, 1]} : vector<8x8xf32> to vector<8x1xf32>
    %47 = vector.extract_strided_slice %1 {offsets = [7, 0], sizes = [1, 128], strides = [1, 1]} : vector<8x128xf32> to vector<1x128xf32>
    %48 = vector.broadcast %46 : vector<8x1xf32> to vector<8x128xf32>
    %49 = vector.broadcast %47 : vector<1x128xf32> to vector<8x128xf32>
    %50 = arith.mulf %48, %49 : vector<8x128xf32>
    %51 = arith.addf %45, %50 : vector<8x128xf32>
    %cst = arith.constant 0.000000e+00 : f32
    %52 = vector.broadcast %cst : f32 to vector<8x128xf32>
    %53 = arith.maximumf %51, %52 : vector<8x128xf32>
    %54 = arith.truncf %53 : vector<8x128xf32> to vector<8x128xbf16>
    %c0_5 = arith.constant 0 : index
    %c0_6 = arith.constant 0 : index
    %55 = vector.load %arg4[%c0_5, %c0_6] : memref<128x128xbf16, #tpu.memory_space<vmem>>, vector<128x128xbf16>
    %cst_7 = arith.constant dense<0.000000e+00> : vector<8x128xf32>
    %56 = tpu.matmul %54, %55, %cst_7 {dimension_numbers = #tpu.dot_dimension_numbers<[1], [0], [0], [1], [0, 0, 1, 1], [], []>} : vector<8x128xbf16>, vector<128x128xbf16>, vector<8x128xf32> -> vector<8x128xf32>
    %c0_8 = arith.constant 0 : index
    %c0_9 = arith.constant 0 : index
    %57 = vector.load %arg5[%c0_8, %c0_9] : memref<1x128xf32, #tpu.memory_space<vmem>>, vector<1x128xf32>
    %58 = vector.broadcast %57 : vector<1x128xf32> to vector<8x128xf32>
    %59 = arith.addf %56, %58 : vector<8x128xf32>
    %cst_10 = arith.constant 0.000000e+00 : f32
    %60 = vector.broadcast %cst_10 : f32 to vector<8x128xf32>
    %61 = arith.maximumf %59, %60 : vector<8x128xf32>
    %62 = arith.truncf %61 : vector<8x128xf32> to vector<8x128xbf16>
    %c0_11 = arith.constant 0 : index
    %c0_12 = arith.constant 0 : index
    %63 = vector.load %arg6[%c0_11, %c0_12] : memref<128x128xbf16, #tpu.memory_space<vmem>>, vector<128x128xbf16>
    %cst_13 = arith.constant dense<0.000000e+00> : vector<8x128xf32>
    %64 = tpu.matmul %62, %63, %cst_13 {dimension_numbers = #tpu.dot_dimension_numbers<[1], [0], [0], [1], [0, 0, 1, 1], [], []>} : vector<8x128xbf16>, vector<128x128xbf16>, vector<8x128xf32> -> vector<8x128xf32>
    %c0_14 = arith.constant 0 : index
    %c0_15 = arith.constant 0 : index
    %65 = vector.load %arg7[%c0_14, %c0_15] : memref<1x128xf32, #tpu.memory_space<vmem>>, vector<1x128xf32>
    %66 = vector.broadcast %65 : vector<1x128xf32> to vector<8x128xf32>
    %67 = arith.addf %64, %66 : vector<8x128xf32>
    %c0_16 = arith.constant 0 : index
    %c0_17 = arith.constant 0 : index
    %68 = vector.load %arg8[%c0_16, %c0_17] : memref<8x128xf32, #tpu.memory_space<vmem>>, vector<8x128xf32>
    tpu.vector_store %arg8[%c0_16, %c0_17], %67 {strides = array<i32>} : memref<8x128xf32, #tpu.memory_space<vmem>>, vector<8x128xf32>,
    return
  }
  func.func @transform_0(%arg0: i32) -> (i32, i32) {
    %c0_i32 = arith.constant 0 : i32
    %c0_i32_0 = arith.constant 0 : i32
    return %arg0, %c0_i32 : i32, i32
  }
  func.func @transform_1(%arg0: i32) -> (i32, i32) {
    %c0_i32 = arith.constant 0 : i32
    %c0_i32_0 = arith.constant 0 : i32
    %c0_i32_1 = arith.constant 0 : i32
    return %c0_i32, %c0_i32_0 : i32, i32
  }
  func.func @transform_2(%arg0: i32) -> (i32, i32) {
    %c0_i32 = arith.constant 0 : i32
    %c0_i32_0 = arith.constant 0 : i32
    %c0_i32_1 = arith.constant 0 : i32
    return %c0_i32, %c0_i32_0 : i32, i32
  }
  func.func @transform_3(%arg0: i32) -> (i32, i32) {
    %c0_i32 = arith.constant 0 : i32
    %c0_i32_0 = arith.constant 0 : i32
    %c0_i32_1 = arith.constant 0 : i32
    return %c0_i32, %c0_i32_0 : i32, i32
  }
  func.func @transform_4(%arg0: i32) -> (i32, i32) {
    %c0_i32 = arith.constant 0 : i32
    %c0_i32_0 = arith.constant 0 : i32
    %c0_i32_1 = arith.constant 0 : i32
    return %c0_i32, %c0_i32_0 : i32, i32
  }
  func.func @transform_5(%arg0: i32) -> (i32, i32) {
    %c0_i32 = arith.constant 0 : i32
    %c0_i32_0 = arith.constant 0 : i32
    %c0_i32_1 = arith.constant 0 : i32
    return %c0_i32, %c0_i32_0 : i32, i32
  }
  func.func @transform_6(%arg0: i32) -> (i32, i32) {
    %c0_i32 = arith.constant 0 : i32
    %c0_i32_0 = arith.constant 0 : i32
    %c0_i32_1 = arith.constant 0 : i32
    return %c0_i32, %c0_i32_0 : i32, i32
  }
  func.func @transform_7(%arg0: i32) -> (i32, i32) {
    %c0_i32 = arith.constant 0 : i32
    %c0_i32_0 = arith.constant 0 : i32
    return %arg0, %c0_i32 : i32, i32
  }
}

</mosaic_0001>

<bundles_post_ra>
// kernel: mlp_forward.1
= control target key start
LH: loop header
LB: loop body
LE: loop exit
PB: predicated region body
PF: predicated region fallthrough
CT: control target
= control target key end

     0   :  { %v460_v0 = vmov 2   ;;  %v461_v1 = vmov 0   ;;  %v462_v4 = vmov 0.0   ;;  %v463_v6 = vmov 3   ;;  %s594_s0 = inlined_call_operand.vmem [shape: f32[8,8], index: 0, kind: input, shape index: {}]   ;;  %s595_s3 = inlined_call_operand.vmem [shape: bf16[128,128], index: 3, kind: input, shape index: {}]   ;;  %s596_s5 = inlined_call_operand.vmem [shape: bf16[128,128], index: 5, kind: input, shape index: {}]   ;;  %s597_s1 = inlined_call_operand.vmem [shape: f32[8,128], index: 1, kind: input, shape index: {}]   ;;  %s598_s2 = inlined_call_operand.vmem [shape: f32[1,128], index: 2, kind: input, shape index: {}]   ;;  %s599_s4 = inlined_call_operand.vmem [shape: f32[1,128], index: 4, kind: input, shape index: {}]   ;;  %s600_s6 = inlined_call_operand.vmem [shape: f32[1,128], index: 6, kind: input, shape index: {}]   ;;  %s601_s7 = inlined_call_operand.vmem [shape: f32[8,128], index: 7, kind: output, shape index: {}]  }
   0x1   :  { %437 = vset.pattern.permute.xlu1 %v460_v0  ;;  %435 = vset.pattern.permute.xlu0 %v461_v1  ;;  %v27_v2 = vld [vmem:[%s594_s0] sm:$0xff]  ;;  %v444_v3 = vld [vmem:[%s595_s3 + $0x38] sm:$0xff]   ;;  %v445_v5 = vld [vmem:[%s595_s3 + $0x30] sm:$0xff]   ;;  %v464_v7 = vmov 1   ;;  %v465_v9 = vmov 4   ;;  %v466_v10 = vmov 5   ;;  %v35_v24 = vlaneseq }
   0x2   :  { %58 = vperm.xlu1 %437, %v27_v2   ;;  %32 = vperm.xlu0 %435, %v27_v2   ;;  %v446_v8 = vld [vmem:[%s595_s3 + $0x28] sm:$0xff]   ;;  %v447_v11 = vld [vmem:[%s595_s3 + $0x20] sm:$0xff]   ;;  %v467_v12 = vmov 6   ;;  %v468_v13 = vmov 7   ;;  %v448_v14 = vld [vmem:[%s595_s3 + $0x18] sm:$0xff]   ;;  %vm469_vm0 = vmmov 0  }
   0x3   :  { %385 = vmatprep.subr.bf16.mxu0 %v462_v4  ;;  %405 = vmatprep.subr.bf16.mxu1 %v462_v4  ;;  %v449_v15 = vld [vmem:[%s595_s3 + $0x10] sm:$0xff]   ;;  %v450_v16 = vld [vmem:[%s595_s3 + $0x8] sm:$0xff]   ;;  %v452_v17 = vld [vmem:[%s596_s5 + $0x38] sm:$0xff]   ;;  %v36_v25 = vshrl.u32 %v35_v24, 7 }
   0x4   :  { %386 = vmatpush3.bf16.msra.mxu0 %v444_v3  ;;  %401 = vmatprep.mubr.msk.bf16.mxu0 %vm469_vm0, %v462_v4  ;;  %v451_v18 = vld [vmem:[%s595_s3] sm:$0xff]   ;;  %v453_v19 = vld [vmem:[%s596_s5 + $0x30] sm:$0xff]   ;;  %v454_v20 = vld [vmem:[%s596_s5 + $0x28] sm:$0xff]  }
   0x5   :  { %387 = vmatprep.subr.bf16.mxu0 %v462_v4  ;;  %421 = vmatprep.mubr.msk.bf16.mxu1 %vm469_vm0, %v462_v4  ;;  %v455_v21 = vld [vmem:[%s596_s5 + $0x20] sm:$0xff]   ;;  %v456_v22 = vld [vmem:[%s596_s5 + $0x18] sm:$0xff]   ;;  %v457_v23 = vld [vmem:[%s596_s5 + $0x10] sm:$0xff]   ;;  %v37_v26 = vsub.s32 0, %v36_v25  ;;  %v53_v29 = vsub.s32 1, %v36_v25  ;;  %v63_v30 = vsub.s32 2, %v36_v25 }
   0x6   :  { %438 = vset.pattern.permute.xlu1 %v463_v6  ;;  %436 = vset.pattern.permute.xlu0 %v464_v7  ;;  %v28_v27 = vld [vmem:[%s597_s1] sm:$0xff]  ;;  %v73_v35 = vsub.s32 3, %v36_v25  ;;  %v83_v37 = vsub.s32 4, %v36_v25  ;;  %v93_v42 = vsub.s32 5, %v36_v25  ;;  %v103_v49 = vsub.s32 6, %v36_v25  ;;  %v458_v7 = vld [vmem:[%s596_s5 + $0x8] sm:$0xff]  }
   0x7   :  { %68 = vperm.xlu1 %438, %v27_v2   ;;  %48 = vperm.xlu0 %436, %v27_v2   ;;  %v38_v28 = vrot.slane %v28_v27, %v37_v26  ;;  %v348_v33 = vld [vmem:[%s598_s2] ss:$0 sm:$0xff]  ;;  %v54_v36 = vrot.slane %v28_v27, %v53_v29  ;;  %v64_v38 = vrot.slane %v28_v27, %v63_v30  ;;  %v113_v58 = vsub.s32 7, %v36_v25 }
   0x8   :  { %388 = vmatpush3.bf16.msra.mxu0 %v445_v5  ;;  %406 = vmatpush3.bf16.msra.mxu1 %v452_v17  ;;  %v74_v43 = vrot.slane %v28_v27, %v73_v35  ;;  %v84_v45 = vrot.slane %v28_v27, %v83_v37  ;;  %v94_v48 = vrot.slane %v28_v27, %v93_v42 }
   0x9   :  { %389 = vmatprep.subr.bf16.mxu0 %v462_v4  ;;  %407 = vmatprep.subr.bf16.mxu1 %v462_v4  ;;  %v104_v57 = vrot.slane %v28_v27, %v103_v49  ;;  %v114_v63 = vrot.slane %v28_v27, %v113_v58 }
   0xb   :  { %439 = vset.pattern.permute.xlu1 %v465_v9  ;;  %440 = vset.pattern.permute.xlu0 %v466_v10  ;;  %v349_v9 = vld [vmem:[%s599_s4] ss:$0 sm:$0xff] }
   0xc   :  { %78 = vperm.xlu1 %439, %v27_v2   ;;  %88 = vperm.xlu0 %440, %v27_v2  }
   0xd   :  { %390 = vmatpush3.bf16.msra.mxu0 %v446_v8  ;;  %408 = vmatpush3.bf16.msra.mxu1 %v453_v19  ;;  %v459_v8 = vld [vmem:[%s596_s5] sm:$0xff]  }
   0xe   :  { %391 = vmatprep.subr.bf16.mxu0 %v462_v4  ;;  %409 = vmatprep.subr.bf16.mxu1 %v462_v4 }
  0x10   :  { %441 = vset.pattern.permute.xlu1 %v467_v12  ;;  %443 = vset.pattern.permute.xlu0 %v468_v13 }
  0x11   :  { %98 = vperm.xlu1 %441, %v27_v2   ;;  %392 = vmatpush3.bf16.msra.mxu0 %v447_v11 }
  0x12   :  { %393 = vmatprep.subr.bf16.mxu0 %v462_v4  ;;  %410 = vmatpush3.bf16.msra.mxu1 %v454_v20 }
  0x13   :  { %411 = vmatprep.subr.bf16.mxu1 %v462_v4 }
  0x15   :  { %442 = vset.pattern.permute.xlu1 %v468_v13  ;;  %394 = vmatpush3.bf16.msra.mxu0 %v448_v14 }
  0x16   :  { %108 = vperm.xlu1 %442, %v27_v2   ;;  %395 = vmatprep.subr.bf16.mxu0 %v462_v4 }
  0x17   :  { %412 = vmatpush3.bf16.msra.mxu1 %v455_v21 }
  0x18   :  { %413 = vmatprep.subr.bf16.mxu1 %v462_v4 }
  0x19   :  { %396 = vmatpush3.bf16.msra.mxu0 %v449_v15 }
  0x1a   :  { %397 = vmatprep.subr.bf16.mxu0 %v462_v4 }
  0x1b   :  { %414 = vmatpush3.bf16.msra.mxu1 %v456_v22 }
  0x1c   :  { %415 = vmatprep.subr.bf16.mxu1 %v462_v4 }
  0x1d   :  { %398 = vmatpush3.bf16.msra.mxu0 %v450_v16 }
  0x1e   :  { %399 = vmatprep.subr.bf16.mxu0 %v462_v4 }
  0x1f   :  { %416 = vmatpush3.bf16.msra.mxu1 %v457_v23 }
  0x20   :  { %417 = vmatprep.subr.bf16.mxu1 %v462_v4 }
  0x21   :  { %400 = vmatpush3.bf16.msra.mxu0 %v451_v18 }
  0x23   :  { %418 = vmatpush3.bf16.msra.mxu1 %v458_v7 }
  0x24   :  { %419 = vmatprep.subr.bf16.mxu1 %v462_v4  ;;  %v358_v4 = vld [vmem:[%s600_s6] ss:$0 sm:$0xff] }
  0x27   :  { %420 = vmatpush3.bf16.msra.mxu1 %v459_v8 }
  0x7d   :  { %v59_v31 = vpop.permute.xlu1 %58  ;;  %v33_v32 = vpop.permute.xlu0 %32 }
  0x7e   :  { %v39_v34 = vmul.f32 %v38_v28, %v33_v32  ;;  %v65_v46 = vmul.f32 %v64_v38, %v59_v31 }
  0x80   :  { %v46_v39 = vadd.f32 %v348_v33, %v39_v34 }
  0x82   :  { %v69_v40 = vpop.permute.xlu1 %68  ;;  %v49_v41 = vpop.permute.xlu0 %48 }
  0x83   :  { %v55_v44 = vmul.f32 %v54_v36, %v49_v41  ;;  %v75_v50 = vmul.f32 %v74_v43, %v69_v40 }
  0x85   :  { %v56_v47 = vadd.f32 %v55_v44, %v46_v39 }
  0x87   :  { %v66_v51 = vadd.f32 %v65_v46, %v56_v47  ;;  %v79_v52 = vpop.permute.xlu1 %78  ;;  %v89_v53 = vpop.permute.xlu0 %88 }
  0x88   :  { %v85_v54 = vmul.f32 %v84_v45, %v79_v52  ;;  %v95_v56 = vmul.f32 %v94_v48, %v89_v53 }
  0x89   :  { %v76_v55 = vadd.f32 %v75_v50, %v66_v51 }
  0x8b   :  { %v86_v59 = vadd.f32 %v85_v54, %v76_v55 }
  0x8c   :  { %v99_v60 = vpop.permute.xlu1 %98 }
  0x8d   :  { %v96_v61 = vadd.f32 %v95_v56, %v86_v59  ;;  %v105_v62 = vmul.f32 %v104_v57, %v99_v60 }
  0x8f   :  { %v106_v1 = vadd.f32 %v105_v62, %v96_v61 }
  0x91   :  { %v109_v0 = vpop.permute.xlu1 %108 }
  0x92   :  { %v115_v2 = vmul.f32 %v114_v63, %v109_v0 }
  0x94   :  { %v116_v3 = vadd.f32 %v115_v2, %v106_v1 }
  0x96   :  { %v117_v5 = vmax.f32 %v116_v3, 0.0 }
  0x98   :  { %v118_v6 = vpack.c.bf16 %v117_v5, %v117_v5 }
  0x9a   :  { %402 = vmatmul.mubr.bf16.vlgmr.msra.gmra.mxu0 %v118_v6 }
 0x15a   :  { %v224_v10 = vpop.f32.mrf.mxu0 }
 0x15b   :  { %v225_v11 = vadd.f32 %v349_v9, %v224_v10 }
 0x15c   :  { %v403_v12 = vpop.f32.mrf.mxu0 }
 0x15d   :  { %v230_v13 = vmax.f32 %v225_v11, 0.0 }
 0x15e   :  { %v227_v14 = vpop.f32.mrf.mxu0 }
 0x15f   :  { %v231_v15 = vpack.c.bf16 %v230_v13, %v230_v13 }
 0x160   :  { %v404_v16 = vpop.f32.mrf.mxu0 }
 0x161   :  { %422 = vmatmul.mubr.bf16.vlgmr.msra.gmra.mxu1 %v231_v15 }
 0x221   :  { %v337_v17 = vpop.f32.mrf.mxu1 }
 0x222   :  { %v338_v18 = vadd.f32 %v358_v4, %v337_v17 }
 0x223   :  { %v423_v19 = vpop.f32.mrf.mxu1 }
 0x224   :  { %343 = vst [vmem:[%s601_s7] sm:$0xff] %v338_v18 }
 0x225   :  { %v340_v20 = vpop.f32.mrf.mxu1 }
 0x227   :  { %v424_v21 = vpop.f32.mrf.mxu1 }

</bundles_post_ra>
